<compile_context>
chip_gen: v6e
topology: v6e:2x2x1
jax: 0.10.0
libtpu: 0.0.40
codegen_flags: <defaults>
</compile_context>

<pallas_src>
import functools
from typing import List

import jax
import jax.numpy as jnp
from jax.experimental import pallas as pl
from jax.experimental.pallas import tpu as pltpu


def _round_up(x: int, m: int) -> int:
    return (x + m - 1) // m * m


def default_activation_dtype():
    """bf16 tanh/activations on v6e/v7x (bf16 VPU/EUP); f32 on v5e/older."""
    try:
        kind = jax.devices()[0].device_kind.lower()
    except Exception:
        return jnp.float32
    if "v6" in kind or "v7" in kind:
        return jnp.bfloat16
    return jnp.float32


# ----------------------------------------------------------------------------
# Kernel
# ----------------------------------------------------------------------------
def _mlp_kernel(num_hidden, offs, k_dims, act_dtype,
                x_ref, wh_ref, bh_ref, wl_ref, bl_ref, o_ref):
    """Fused MLP forward on one (tm, in0_pad) batch tile.

    wh_ref : hidden-layer weight slab (sum(k_dims), lane) bf16, each layer
             pre-transposed to (in, out); padded rows/cols are zero.
    bh_ref : hidden biases (num_hidden, 1, lane) f32 (padded cols zero).
    wl_ref : last-layer weight (k_last, out_pad) bf16 — narrow output slab.
    bl_ref : last-layer bias (1, out_pad) f32.

    All matmuls feed bf16 operands to the MXU (native on v5e/v6e/v7x) with f32
    accumulation. tanh runs in act_dtype (bf16 on v6e/v7x, f32 on v5e).
    Zero-padded weight/bias columns stay exactly zero through tanh, so padded
    lanes never contaminate real outputs.
    """
    h = x_ref[...]                                          # (tm, in0_pad) f32
    for li in range(num_hidden):
        # Static, 16-row-aligned slice of the resident bf16 slab (free view).
        w = wh_ref[offs[li]:offs[li] + k_dims[li], :]
        acc = jnp.dot(h.astype(jnp.bfloat16), w,
                      preferred_element_type=jnp.float32)   # bf16 MXU, f32 acc
        acc = acc + bh_ref[li]                              # (1, lane) f32
        h = jnp.tanh(acc.astype(act_dtype))                 # bf16 v6e/v7x, f32 v5e
    out = jnp.dot(h.astype(jnp.bfloat16), wl_ref[...],
                  preferred_element_type=jnp.float32)       # narrow last layer
    o_ref[...] = (out + bl_ref[...]).astype(o_ref.dtype)    # tiny writeback


# ----------------------------------------------------------------------------
# Parameter init (PyTorch nn.Linear-style), packing, wrapper, reference
# ----------------------------------------------------------------------------
def init_value_network_params(key, num_inputs: int, num_hiddens: List[int],
                              num_outputs: int):
    """U(-1/sqrt(fan_in), 1/sqrt(fan_in)); last layer weight*0.1, bias*0.
    Returns flat list [w0, b0, w1, b1, ...]; weights (out, in), biases (1, out)."""
    params = []
    dims_in = num_inputs
    layer_dims = list(num_hiddens) + [num_outputs]
    for i, dims_out in enumerate(layer_dims):
        key, kw, kb = jax.random.split(key, 3)
        bound = 1.0 / jnp.sqrt(jnp.float32(dims_in))
        w = jax.random.uniform(kw, (dims_out, dims_in), jnp.float32,
                               minval=-bound, maxval=bound)
        b = jax.random.uniform(kb, (1, dims_out), jnp.float32,
                               minval=-bound, maxval=bound)
        if i == len(layer_dims) - 1:
            w = w * 0.1
            b = b * 0.0
        params.append(w)
        params.append(b)
        dims_in = dims_out
    return params


def pack_value_network_params(params, weight_dtype=jnp.bfloat16):
    """Pack hidden-layer weights into one pre-transposed, lane-aligned bf16
    slab (row offsets aligned to 16 = bf16 sublane tile) plus one f32 bias
    slab, and the last layer into its own narrow (k_last, out_pad) slab."""
    num_layers = len(params) // 2
    out_dims = [params[2 * i].shape[0] for i in range(num_layers)]
    in_dims = [params[2 * i].shape[1] for i in range(num_layers)]
    num_hidden = num_layers - 1

    in0_pad = _round_up(in_dims[0], 16)       # bf16 tile = (16, 128) rows
    out_pad = _round_up(out_dims[-1], 8)      # narrow last-layer lane width

    if num_hidden > 0:
        lane = max(_round_up(d, 128) for d in out_dims[:-1])  # keep 128-based
        k_dims = [in0_pad] + [lane] * (num_hidden - 1)        # all mult. of 16
        offs = [0]
        for k in k_dims[:-1]:
            offs.append(offs[-1] + k)
        rows = offs[-1] + k_dims[-1]
        wh = jnp.zeros((rows, lane), weight_dtype)
        bh = jnp.zeros((num_hidden, 1, lane), jnp.float32)
        for li in range(num_hidden):
            wh = wh.at[offs[li]:offs[li] + in_dims[li], :out_dims[li]].set(
                params[2 * li].T.astype(weight_dtype))
            bh = bh.at[li, :, :out_dims[li]].set(
                params[2 * li + 1].reshape(1, -1).astype(jnp.float32))
        k_last = lane
    else:
        # No hidden layers: last layer contracts directly over the input.
        k_dims, offs = (), ()
        wh = jnp.zeros((16, 128), weight_dtype)      # unused dummy slab
        bh = jnp.zeros((1, 1, 128), jnp.float32)     # unused dummy slab
        k_last = in0_pad

    wl = jnp.zeros((k_last, out_pad), weight_dtype)
    wl = wl.at[:in_dims[-1], :out_dims[-1]].set(
        params[-2].T.astype(weight_dtype))
    bl = jnp.zeros((1, out_pad), jnp.float32)
    bl = bl.at[:, :out_dims[-1]].set(
        params[-1].reshape(1, -1).astype(jnp.float32))

    meta = dict(num_hidden=num_hidden, offs=tuple(offs), k_dims=tuple(k_dims),
                in0_pad=in0_pad, out_pad=out_pad,
                num_inputs=in_dims[0], num_outputs=out_dims[-1])
    return (wh, bh, wl, bl), meta


def value_network_forward(x, packed, *, act_dtype=None, tm_target: int = 1024):
    """Run the fused MLP Pallas kernel. x: (batch, num_inputs) float32."""
    (wh, bh, wl, bl), meta = packed
    if act_dtype is None:
        act_dtype = default_activation_dtype()

    batch, nin = x.shape
    in0_pad, out_pad = meta["in0_pad"], meta["out_pad"]

    # Batch tiling: large tiles amortize the ~0.35us per-grid-step overhead,
    # but keep >= 2 grid steps when possible so v7x's 2 TCs both get work.
    bp8 = _round_up(batch, 8)
    if bp8 <= tm_target:
        tm = _round_up(pl.cdiv(bp8, 2), 8) if bp8 >= 16 else bp8
    else:
        tm = tm_target
    batch_pad = _round_up(bp8, tm)

    # Single fused pad (batch + feature); skipped entirely when aligned.
    xp = x.astype(jnp.float32)
    if batch_pad != batch or in0_pad != nin:
        xp = jnp.pad(xp, ((0, batch_pad - batch), (0, in0_pad - nin)))

    kernel = functools.partial(_mlp_kernel, meta["num_hidden"], meta["offs"],
                               meta["k_dims"], act_dtype)

    out_padded = pl.pallas_call(
        kernel,
        out_shape=jax.ShapeDtypeStruct((batch_pad, out_pad), jnp.float32),
        grid=(batch_pad // tm,),
        in_specs=[
            pl.BlockSpec((tm, in0_pad), lambda i: (i, 0)),     # batch tile
            pl.BlockSpec(wh.shape, lambda i: (0, 0)),          # VMEM-resident
            pl.BlockSpec(bh.shape, lambda i: (0, 0, 0)),       # VMEM-resident
            pl.BlockSpec(wl.shape, lambda i: (0, 0)),          # VMEM-resident
            pl.BlockSpec(bl.shape, lambda i: (0, 0)),          # VMEM-resident
        ],
        out_specs=pl.BlockSpec((tm, out_pad), lambda i: (i, 0)),  # narrow store
        compiler_params=pltpu.CompilerParams(
            dimension_semantics=("parallel",),                 # v7x: 2 TCs
        ),
    )(xp, wh, bh, wl, bl)

    if batch_pad != batch or out_pad != meta["num_outputs"]:
        return out_padded[:batch, :meta["num_outputs"]]
    return out_padded


def value_network_ref(x, params, act_dtype, weight_dtype=jnp.bfloat16):
    """Pure-JAX reference mirroring the kernel's dtype path (bf16 MXU operands,
    f32 accumulation, act_dtype tanh)."""
    num_layers = len(params) // 2
    h = x.astype(jnp.float32)
    for li in range(num_layers):
        w = params[2 * li].astype(weight_dtype)
        b = params[2 * li + 1].reshape(1, -1).astype(jnp.float32)
        acc = jnp.dot(h.astype(weight_dtype), w.T,
                      preferred_element_type=jnp.float32) + b
        if li != num_layers - 1:
            h = jnp.tanh(acc.astype(act_dtype))
        else:
            h = acc
    return h


if __name__ == "__main__":
    # Small shapes consistent with the module: ValueNetwork(32, [64, 32], 4)
    batch = 8
    num_inputs = 32
    num_hiddens = [64, 32]
    num_outputs = 4

    key = jax.random.PRNGKey(0)
    key, kx = jax.random.split(key)
    x = jax.random.normal(kx, (batch, num_inputs), jnp.float32)

    params = init_value_network_params(key, num_inputs, num_hiddens, num_outputs)
    packed = pack_value_network_params(params, weight_dtype=jnp.bfloat16)

    act_dtype = default_activation_dtype()
    out = value_network_forward(x, packed, act_dtype=act_dtype)
    out = jax.block_until_ready(out)

    ref = value_network_ref(x, params, act_dtype)
    assert out.shape == (batch, num_outputs)
    tol = 2.5e-2 if act_dtype == jnp.bfloat16 else 1e-4
    assert jnp.allclose(out, ref, atol=tol, rtol=tol), (
        "mismatch vs reference: max abs diff = "
        f"{float(jnp.max(jnp.abs(out - ref)))}")

    print("KERNEL_OK")
</pallas_src>

<mosaic_0001>
module attributes {stable_mosaic.version = 11 : i64} {
  func.func @_mlp_kernel(%arg0: i32, %arg1: memref<8x32xf32, #tpu.memory_space<vmem>>, %arg2: memref<160x128xbf16, #tpu.memory_space<vmem>>, %arg3: memref<2x1x128xf32, #tpu.memory_space<vmem>>, %arg4: memref<128x8xbf16, #tpu.memory_space<vmem>>, %arg5: memref<1x8xf32, #tpu.memory_space<vmem>>, %arg6: memref<8x8xf32, #tpu.memory_space<vmem>>) attributes {dimension_semantics = [#tpu.dimension_semantics<parallel>], iteration_bounds = array<i64: 1>, scalar_prefetch = 0 : i64, scratch_operands = 0 : i64, tpu.core_type = #tpu.core_type<tc>, window_params = [{transform_indices = @transform_0, window_bounds = array<i64: 8, 32>}, {pipeline_mode = #tpu.pipeline_mode<synchronous>, transform_indices = @transform_1, window_bounds = array<i64: 160, 128>}, {pipeline_mode = #tpu.pipeline_mode<synchronous>, transform_indices = @transform_2, window_bounds = array<i64: 2, 1, 128>}, {pipeline_mode = #tpu.pipeline_mode<synchronous>, transform_indices = @transform_3, window_bounds = array<i64: 128, 8>}, {pipeline_mode = #tpu.pipeline_mode<synchronous>, transform_indices = @transform_4, window_bounds = array<i64: 1, 8>}, {transform_indices = @transform_5, window_bounds = array<i64: 8, 8>}]} {
    %c0 = arith.constant 0 : index
    %c0_0 = arith.constant 0 : index
    %0 = vector.load %arg1[%c0, %c0_0] : memref<8x32xf32, #tpu.memory_space<vmem>>, vector<8x32xf32>
    %c0_1 = arith.constant 0 : index
    %c0_2 = arith.constant 0 : index
    %1 = vector.load %arg2[%c0_1, %c0_2] : memref<160x128xbf16, #tpu.memory_space<vmem>>, vector<32x128xbf16>
    %2 = arith.truncf %0 : vector<8x32xf32> to vector<8x32xbf16>
    %cst = arith.constant dense<0.000000e+00> : vector<8x128xf32>
    %3 = tpu.matmul %2, %1, %cst {dimension_numbers = #tpu.dot_dimension_numbers<[1], [0], [0], [1], [0, 0, 1, 1], [], []>} : vector<8x32xbf16>, vector<32x128xbf16>, vector<8x128xf32> -> vector<8x128xf32>
    %c0_3 = arith.constant 0 : index
    %c0_4 = arith.constant 0 : index
    %c0_5 = arith.constant 0 : index
    %4 = vector.load %arg3[%c0_3, %c0_4, %c0_5] : memref<2x1x128xf32, #tpu.memory_space<vmem>>, vector<1x1x128xf32>
    %5 = vector.shape_cast %4 : vector<1x1x128xf32> to vector<1x128xf32>
    %6 = vector.broadcast %5 : vector<1x128xf32> to vector<8x128xf32>
    %7 = arith.addf %3, %6 : vector<8x128xf32>
    %8 = math.tanh %7 : vector<8x128xf32>
    %c32 = arith.constant 32 : index
    %c0_6 = arith.constant 0 : index
    %9 = vector.load %arg2[%c32, %c0_6] : memref<160x128xbf16, #tpu.memory_space<vmem>>, vector<128x128xbf16>
    %10 = arith.truncf %8 : vector<8x128xf32> to vector<8x128xbf16>
    %cst_7 = arith.constant dense<0.000000e+00> : vector<8x128xf32>
    %11 = tpu.matmul %10, %9, %cst_7 {dimension_numbers = #tpu.dot_dimension_numbers<[1], [0], [0], [1], [0, 0, 1, 1], [], []>} : vector<8x128xbf16>, vector<128x128xbf16>, vector<8x128xf32> -> vector<8x128xf32>
    %c1 = arith.constant 1 : index
    %c0_8 = arith.constant 0 : index
    %c0_9 = arith.constant 0 : index
    %12 = vector.load %arg3[%c1, %c0_8, %c0_9] : memref<2x1x128xf32, #tpu.memory_space<vmem>>, vector<1x1x128xf32>
    %13 = vector.shape_cast %12 : vector<1x1x128xf32> to vector<1x128xf32>
    %14 = vector.broadcast %13 : vector<1x128xf32> to vector<8x128xf32>
    %15 = arith.addf %11, %14 : vector<8x128xf32>
    %16 = math.tanh %15 : vector<8x128xf32>
    %17 = arith.truncf %16 : vector<8x128xf32> to vector<8x128xbf16>
    %c0_10 = arith.constant 0 : index
    %c0_11 = arith.constant 0 : index
    %18 = vector.load %arg4[%c0_10, %c0_11] : memref<128x8xbf16, #tpu.memory_space<vmem>>, vector<128x8xbf16>
    %cst_12 = arith.constant dense<0.000000e+00> : vector<8x8xf32>
    %19 = tpu.matmul %17, %18, %cst_12 {dimension_numbers = #tpu.dot_dimension_numbers<[1], [0], [0], [1], [0, 0, 1, 1], [], []>} : vector<8x128xbf16>, vector<128x8xbf16>, vector<8x8xf32> -> vector<8x8xf32>
    %c0_13 = arith.constant 0 : index
    %c0_14 = arith.constant 0 : index
    %20 = vector.load %arg5[%c0_13, %c0_14] : memref<1x8xf32, #tpu.memory_space<vmem>>, vector<1x8xf32>
    %21 = vector.broadcast %20 : vector<1x8xf32> to vector<8x8xf32>
    %22 = arith.addf %19, %21 : vector<8x8xf32>
    %c0_15 = arith.constant 0 : index
    %c0_16 = arith.constant 0 : index
    %23 = vector.load %arg6[%c0_15, %c0_16] : memref<8x8xf32, #tpu.memory_space<vmem>>, vector<8x8xf32>
    tpu.vector_store %arg6[%c0_15, %c0_16], %22 {strides = array<i32>} : memref<8x8xf32, #tpu.memory_space<vmem>>, vector<8x8xf32>,
    return
  }
  func.func @transform_0(%arg0: i32) -> (i32, i32) {
    %c0_i32 = arith.constant 0 : i32
    %c0_i32_0 = arith.constant 0 : i32
    return %arg0, %c0_i32 : i32, i32
  }
  func.func @transform_1(%arg0: i32) -> (i32, i32) {
    %c0_i32 = arith.constant 0 : i32
    %c0_i32_0 = arith.constant 0 : i32
    %c0_i32_1 = arith.constant 0 : i32
    return %c0_i32, %c0_i32_0 : i32, i32
  }
  func.func @transform_2(%arg0: i32) -> (i32, i32, i32) {
    %c0_i32 = arith.constant 0 : i32
    %c0_i32_0 = arith.constant 0 : i32
    %c0_i32_1 = arith.constant 0 : i32
    %c0_i32_2 = arith.constant 0 : i32
    return %c0_i32, %c0_i32_0, %c0_i32_1 : i32, i32, i32
  }
  func.func @transform_3(%arg0: i32) -> (i32, i32) {
    %c0_i32 = arith.constant 0 : i32
    %c0_i32_0 = arith.constant 0 : i32
    %c0_i32_1 = arith.constant 0 : i32
    return %c0_i32, %c0_i32_0 : i32, i32
  }
  func.func @transform_4(%arg0: i32) -> (i32, i32) {
    %c0_i32 = arith.constant 0 : i32
    %c0_i32_0 = arith.constant 0 : i32
    %c0_i32_1 = arith.constant 0 : i32
    return %c0_i32, %c0_i32_0 : i32, i32
  }
  func.func @transform_5(%arg0: i32) -> (i32, i32) {
    %c0_i32 = arith.constant 0 : i32
    %c0_i32_0 = arith.constant 0 : i32
    return %arg0, %c0_i32 : i32, i32
  }
}

</mosaic_0001>

<bundles_post_ra>
// kernel: tpu_custom_call.1
= control target key start
LH: loop header
LB: loop body
LE: loop exit
PB: predicated region body
PF: predicated region fallthrough
CT: control target
= control target key end

     0   :  { %10 = vsyncpa [#allocation3], 0  ;;  %s615_s0 = inlined_call_operand.vmem [shape: f32[8,32], index: 0, kind: input, shape index: {}]   ;;  %s616_s1 = inlined_call_operand.hbm [shape: bf16[160,128], index: 1, kind: input, shape index: {}]   ;;  %s617_s2 = inlined_call_operand.vmem [shape: f32[2,1,128], index: 2, kind: input, shape index: {}]   ;;  %s618_s3 = inlined_call_operand.vmem [shape: bf16[128,8], index: 3, kind: input, shape index: {}]   ;;  %s619_s4 = inlined_call_operand.vmem [shape: f32[1,8], index: 4, kind: input, shape index: {}]   ;;  %s620_s5 = inlined_call_operand.hbm [shape: f32[8,8], index: 5, kind: output, shape index: {}]  }
   0x1   :  { %11 = vsyncpa [#allocation4], 0  ;;  %s513_s18 = smov [#allocation2]  }
   0x2   :  { %s19_s19 = sshll.u32 %s513_s18, 4  ;;  %s20_s19 = int_to_ptr.vmem [resolvable:$true] %s19_s19 }
   0x3   :  { %s477_s20 = scalar_lea.vmem %s20_s19, 1280  ;;  %p482_p1 = scmp.lt.s32.totalorder %s20_s19, %s20_s19 }
   0x4   :  { %p478_p0 = scmp.ne.s32.totalorder %s20_s19, %s477_s20  ;;  %p483_p2 = scmp.lt.s32.totalorder %s477_s20, %s477_s20 }
   0x6   :  { %p484_p3 = por %p483_p2, %p482_p1 }
   0x8   :  { %p485_p4 = pnand %p484_p3, %p478_p0 }
   0xa   :  { %488 = shalt.err (!%p485_p4)
}
   0xb   :  { %s514_s21 = smov 64   ;;  %s515_s22 = smov 4  }
   0xc   :  { %25 = dma.hbm_to_vmem [thread:$0]  %s616_s1, 1280, %s20_s19, [#allocation3], %s514_s21, %s514_s21, %s515_s22  }
   0xd   :  { %509 = dma.done.wait [#allocation3], 1280  }
   0xe   :  { %510 = vsyncadd [#allocation3], 4294966016  ;;  %v516_v0 = vmov 0.0   ;;  %vm517_vm0 = vmmov 0   ;;  %v447_v1 = vld [vmem:[#allocation2 + $0x8] sm:$0xff]   ;;  %v448_v2 = vld [vmem:[#allocation2] sm:$0xff]  }
   0xf   :  { %393 = vmatprep.subr.bf16.mxu0 %v516_v0  ;;  %397 = vmatprep.mubr.msk.bf16.mxu0 %vm517_vm0, %v516_v0  ;;  %v36_v3 = vld [vmem:[%s615_s0] sm:$0xff]  ;;  %v449_v4 = vld [vmem:[#allocation2 + $0x48] sm:$0xff]   ;;  %vm61_vm1 = vcmask 261120   ;;  %v451_v7 = vld [vmem:[#allocation2 + $0x38] sm:$0xff]   ;;  %s518_s22 = smov [#allocation5]   ;;  %vm332_vm2 = vcmask 64512  }
  0x10   :  { %401 = vmatprep.subr.bf16.mxu1 %v516_v0  ;;  %417 = vmatprep.mubr.msk.bf16.mxu1 %vm517_vm0, %v516_v0  ;;  %v41_v5 = vpack.c.bf16 %v36_v3, %v36_v3  ;;  %v450_v6 = vld [vmem:[#allocation2 + $0x40] sm:$0xff]   ;;  %v452_v8 = vld [vmem:[#allocation2 + $0x30] sm:$0xff]   ;;  %v453_v9 = vld [vmem:[#allocation2 + $0x28] sm:$0xff]  }
  0x11   :  { %394 = vmatpush3.bf16.msra.mxu0 %v447_v1  ;;  %402 = vmatpush3.bf16.msra.mxu1 %v449_v4  ;;  %v454_v10 = vld [vmem:[#allocation2 + $0x20] sm:$0xff]   ;;  %v455_v11 = vld [vmem:[#allocation2 + $0x18] sm:$0xff]   ;;  %v456_v12 = vld [vmem:[#allocation2 + $0x10] sm:$0xff]  }
  0x12   :  { %395 = vmatprep.subr.bf16.mxu0 %v516_v0  ;;  %403 = vmatprep.subr.bf16.mxu1 %v516_v0  ;;  %v457_v13 = vld [vmem:[%s618_s3 + $0x38] sm:$0xff]   ;;  %v458_v14 = vld [vmem:[%s618_s3 + $0x30] sm:$0xff]   ;;  %v459_v15 = vld [vmem:[%s618_s3 + $0x28] sm:$0xff]  }
  0x13   :  { %v349_v16 = vld [vmem:[%s617_s2] ss:$0 sm:$0xff]  ;;  %v461_v25 = vld [vmem:[%s618_s3 + $0x18] sm:$0xff]   ;;  %v462_v26 = vld [vmem:[%s618_s3 + $0x10] sm:$0xff]  }
  0x14   :  { %v460_v24 = vld [vmem:[%s618_s3 + $0x20] sm:$0xff]   ;;  %v463_v27 = vld [vmem:[%s618_s3 + $0x8] sm:$0xff]  }
  0x15   :  { %396 = vmatpush3.bf16.msra.mxu0 %v448_v2  ;;  %404 = vmatpush3.bf16.msra.mxu1 %v450_v6  ;;  %v464_v28 = vld [vmem:[%s618_s3] sm:$0xff]   ;;  %s340_s3 = sshll.u32 %s518_s22, 4  ;;  %s341_s3 = int_to_ptr.vmem [resolvable:$true] %s340_s3 }
  0x16   :  { %421 = vmatprep.subr.bf16.mxu0 %v516_v0  ;;  %405 = vmatprep.subr.bf16.mxu1 %v516_v0  ;;  %v354_v29 = vld [vmem:[%s617_s2 + $0x1] ss:$0 sm:$0xff]  ;;  %v363_v37 = vld [vmem:[%s619_s4] ss:$0 sm:$0xff]  ;;  %s489_s2 = scalar_lea.vmem %s341_s3, 128  ;;  %p494_p6 = scmp.lt.s32.totalorder %s341_s3, %s341_s3 }
  0x17   :  { %p490_p5 = scmp.ne.s32.totalorder %s341_s3, %s489_s2  ;;  %p495_p7 = scmp.lt.s32.totalorder %s489_s2, %s489_s2 }
  0x18   :  { %398 = vmatmul.mubr.msk.bf16.vlgmr.msra.gmra.mxu0 %vm61_vm1, %v41_v5 }
  0x19   :  { %437 = vmatprep.mubr.msk.bf16.mxu0 %vm517_vm0, %v516_v0  ;;  %406 = vmatpush3.bf16.msra.mxu1 %v451_v7  ;;  %p496_p8 = por %p495_p7, %p494_p6 }
  0x1a   :  { %407 = vmatprep.subr.bf16.mxu1 %v516_v0  ;;  %422 = vmatpush3.bf16.msra.mxu0 %v457_v13 }
  0x1b   :  { %423 = vmatprep.subr.bf16.mxu0 %v516_v0  ;;  %p497_p9 = pnand %p496_p8, %p490_p5 }
  0x1d   :  { %408 = vmatpush3.bf16.msra.mxu1 %v452_v8 }
  0x1e   :  { %409 = vmatprep.subr.bf16.mxu1 %v516_v0  ;;  %424 = vmatpush3.bf16.msra.mxu0 %v458_v14 }
  0x1f   :  { %425 = vmatprep.subr.bf16.mxu0 %v516_v0 }
  0x21   :  { %410 = vmatpush3.bf16.msra.mxu1 %v453_v9 }
  0x22   :  { %411 = vmatprep.subr.bf16.mxu1 %v516_v0  ;;  %426 = vmatpush3.bf16.msra.mxu0 %v459_v15 }
  0x23   :  { %427 = vmatprep.subr.bf16.mxu0 %v516_v0 }
  0x25   :  { %412 = vmatpush3.bf16.msra.mxu1 %v454_v10 }
  0x26   :  { %413 = vmatprep.subr.bf16.mxu1 %v516_v0  ;;  %428 = vmatpush3.bf16.msra.mxu0 %v460_v24 }
  0x27   :  { %429 = vmatprep.subr.bf16.mxu0 %v516_v0 }
  0x29   :  { %414 = vmatpush3.bf16.msra.mxu1 %v455_v11 }
  0x2a   :  { %415 = vmatprep.subr.bf16.mxu1 %v516_v0  ;;  %430 = vmatpush3.bf16.msra.mxu0 %v461_v25 }
  0x2b   :  { %431 = vmatprep.subr.bf16.mxu0 %v516_v0 }
  0x2d   :  { %416 = vmatpush3.bf16.msra.mxu1 %v456_v12 }
  0x2e   :  { %432 = vmatpush3.bf16.msra.mxu0 %v462_v26 }
  0x2f   :  { %433 = vmatprep.subr.bf16.mxu0 %v516_v0 }
  0x32   :  { %434 = vmatpush3.bf16.msra.mxu0 %v463_v27 }
  0x33   :  { %435 = vmatprep.subr.bf16.mxu0 %v516_v0 }
  0x36   :  { %436 = vmatpush3.bf16.msra.mxu0 %v464_v28 }
  0xd8   :  { %v99_v17 = vpop.f32.mrf.mxu0 }
  0xd9   :  { %v100_v18 = vadd.f32 %v349_v16, %v99_v17 }
  0xda   :  { %v399_v19 = vpop.f32.mrf.mxu0 }
  0xdb   :  { %465 = vtanh.f32 %v100_v18 }
  0xdc   :  { %v102_v20 = vpop.f32.mrf.mxu0 }
  0xde   :  { %v400_v21 = vpop.f32.mrf.mxu0 }
  0xe8   :  { %v466_v22 = vpop.eup %465 }
  0xe9   :  { %v122_v23 = vpack.c.bf16 %v466_v22, %v466_v22 }
  0xeb   :  { %418 = vmatmul.mubr.bf16.vlgmr.msra.gmra.mxu1 %v122_v23 }
 0x1ab   :  { %v213_v30 = vpop.f32.mrf.mxu1 }
 0x1ac   :  { %v214_v31 = vadd.f32 %v354_v29, %v213_v30 }
 0x1ad   :  { %v419_v32 = vpop.f32.mrf.mxu1 }
 0x1ae   :  { %467 = vtanh.f32 %v214_v31 }
 0x1af   :  { %v216_v33 = vpop.f32.mrf.mxu1 }
 0x1b1   :  { %v420_v34 = vpop.f32.mrf.mxu1 }
 0x1bb   :  { %v468_v35 = vpop.eup %467 }
 0x1bc   :  { %v220_v36 = vpack.c.bf16 %v468_v35, %v468_v35 }
 0x1be   :  { %438 = vmatmul.mubr.bf16.vlgmr.msra.gmra.mxu0 %v220_v36 }
 0x27e   :  { %v326_v38 = vpop.f32.mrf.mxu0 }
 0x27f   :  { %v327_v39 = vadd.f32 %v363_v37, %v326_v38 }
 0x280   :  { %v439_v40 = vpop.f32.mrf.mxu0 }
 0x281   :  { %333 = vst.msk [vmem:[#allocation5] sm:$0xff] %vm332_vm2, %v327_v39 }
 0x282   :  { %v329_v41 = vpop.f32.mrf.mxu0 }
 0x283   :  { %500 = shalt.err (!%p497_p9)
}
 0x284   :  { %343 = dma.vmem_to_hbm [thread:$0]  %s341_s3, 128, %s620_s5, [#allocation4]   ;;  %v440_v42 = vpop.f32.mrf.mxu0 }
 0x285   :  { %511 = dma.done.wait [#allocation4], 128  }
 0x286   :  { %512 = vsyncadd [#allocation4], 4294967168 }
 0x287   :  { %347 = vsyncpa [#allocation3], 1 }
 0x288   :  { %348 = vsyncpa [#allocation4], 1 }

</bundles_post_ra>
